<compile_context>
chip_gen: v6e
topology: v6e:2x2x1
jax: 0.10.0
libtpu: 0.0.40
codegen_flags: <defaults>
</compile_context>

<pallas_src>
import functools

import jax
import jax.numpy as jnp
from jax.experimental import pallas as pl
from jax.experimental.pallas import tpu as pltpu


# ---------------------------------------------------------------------------
# Generation-aware sizing constants (v5e/v6e: 128 MiB physical VMEM, v7x: 64).
# ---------------------------------------------------------------------------
try:
    _VMEM_PHYSICAL = int(pltpu.get_tpu_info().vmem_capacity_bytes)
except Exception:  # be conservative if the query is unavailable
    _VMEM_PHYSICAL = 64 * 1024 * 1024

# Budget for the double-buffered input+output voxel tiles (~24 MiB everywhere;
# clamped for hypothetical smaller-VMEM parts).  Multi-MiB tiles amortize the
# ~0.35 us per-grid-step overhead and give long contiguous DMA segments.
_PIPELINE_VMEM_BUDGET = min(24 * 1024 * 1024, int(_VMEM_PHYSICAL * 0.4))
# Scoped-VMEM limit we request: above v5e's 16 MiB scoped default, at/below the
# v6e/v7x 32 MiB default, and far below every generation's physical VMEM.
_VMEM_LIMIT_BYTES = min(_VMEM_PHYSICAL // 2,
                        _PIPELINE_VMEM_BUDGET + 6 * 1024 * 1024)

_VPU_CHANNEL_LIMIT = 8    # use the VPU path when C_in, C_out <= this
_MIN_TOTAL_PROGRAMS = 4   # keep both v7x TensorCores fed + pipeline overlap


def _sublane(dtype):
    """Sublane packing granularity: 8 for f32, 16 for bf16, 32 for int8."""
    return max(1, 32 // jnp.dtype(dtype).itemsize)


def _choose_tile(units, unit, per_unit_bytes, budget, n, requested=None):
    """Largest `unit`-aligned tile along the voxel axis that

    (a) keeps the double-buffered in+out blocks within the VMEM budget, and
    (b) leaves >= _MIN_TOTAL_PROGRAMS grid programs when N is small, so both
        v7x TensorCores get work and there are steps to pipeline across.
    Returns either `units` (full axis) or a multiple of `unit`.
    """
    budget_tile = max(unit, (budget // max(per_unit_bytes, 1)) // unit * unit)
    min_tiles = max(1, -(-_MIN_TOTAL_PROGRAMS // n))      # ceil(4 / n)
    if units >= unit * min_tiles:
        split_tile = max(unit, (units // min_tiles) // unit * unit)
    else:
        split_tile = units                                # too small to split
    tile = min(budget_tile, split_tile)
    if requested is not None:
        tile = min(tile, max(unit, requested // unit * unit))
    if tile >= units:
        return int(units)
    return int(max(unit, tile // unit * unit))


# ---------------------------------------------------------------------------
# Kernels
# ---------------------------------------------------------------------------
def _make_vpu_kernel_planes(c_in, c_out):
    """Tiny-channel path on dense (tile_rows, 128) per-channel planes."""

    def kernel(w_ref, b_ref, x_ref, o_ref):
        # w_ref: SMEM (c_out, c_in) f32    b_ref: SMEM (c_out,) f32
        # x_ref: VMEM (c_in, tr, 128)      o_ref: VMEM (c_out, tr, 128)
        for co in range(c_out):
            acc = w_ref[co, 0] * x_ref[0].astype(jnp.float32)
            for ci in range(1, c_in):
                acc = acc + w_ref[co, ci] * x_ref[ci].astype(jnp.float32)
            o_ref[co] = (acc + b_ref[co]).astype(o_ref.dtype)   # direct write

    return kernel


def _make_vpu_kernel_rows(c_in, c_out):
    """Fallback tiny-channel path when V % 128 != 0: (C, tile_v) rows."""

    def kernel(w_ref, b_ref, x_ref, o_ref):
        # x_ref: VMEM (c_in, tile_v)       o_ref: VMEM (c_out, tile_v)
        for co in range(c_out):
            acc = w_ref[co, 0] * x_ref[0:1, :].astype(jnp.float32)
            for ci in range(1, c_in):
                acc = acc + w_ref[co, ci] * x_ref[ci:ci + 1, :].astype(jnp.float32)
            o_ref[co:co + 1, :] = (acc + b_ref[co]).astype(o_ref.dtype)

    return kernel


def _mxu_kernel(x_ref, w_ref, b_ref, o_ref):
    # x_ref: (c_in, tile_v)  w_ref: (c_out, c_in)  b_ref: (c_out, 1) f32
    # precision=HIGHEST: no bf16 truncation of f32 operands.  The kernel is
    # deeply HBM-bound (<1 flop/byte), so the multi-pass f32 matmul is free.
    acc = jnp.dot(w_ref[...], x_ref[...],
                  preferred_element_type=jnp.float32,
                  precision=jax.lax.Precision.HIGHEST)
    # NOTE: weight/bias blocks are grid-invariant (resident, no re-DMA); the
    # per-step lane broadcast of the (c_out, 1) bias is one VPU op per output
    # vreg and is hidden under the HBM stream.
    o_ref[...] = (acc + b_ref[...]).astype(o_ref.dtype)


# ---------------------------------------------------------------------------
# Wrapper
# ---------------------------------------------------------------------------
@functools.partial(jax.jit, static_argnames=("voxel_tile",))
def feature_map_block_3d(x, weight, bias, voxel_tile=None):
    """Forward pass of FeatureMapBlock3D (nn.Conv3d with kernel_size=1).

    Args:
      x:      (N, C_in, D, H, W)      -- NCDHW, same as PyTorch Conv3d.
      weight: (C_out, C_in, 1, 1, 1)  -- nn.Conv3d weight for kernel_size=1.
      bias:   (C_out,)
      voxel_tile: optional cap (in voxels) on the tile size; default is
        budget-driven.
    Returns:
      (N, C_out, D, H, W)
    """
    n, c_in, d, h, w = x.shape
    c_out = weight.shape[0]
    v = d * h * w
    out_dtype = x.dtype

    in_item = jnp.dtype(x.dtype).itemsize
    out_item = jnp.dtype(out_dtype).itemsize

    cost = pl.CostEstimate(
        flops=2 * n * v * c_in * c_out,
        transcendentals=0,
        bytes_accessed=(n * c_in * v * in_item + n * c_out * v * out_item
                        + c_out * c_in * 4 + c_out * 4),
    )
    compiler_params = pltpu.CompilerParams(
        dimension_semantics=("parallel", "parallel"),
        vmem_limit_bytes=_VMEM_LIMIT_BYTES,
    )

    small_channels = c_in <= _VPU_CHANNEL_LIMIT and c_out <= _VPU_CHANNEL_LIMIT

    # ---------------- dense (rows, 128) per-channel VPU path ----------------
    if small_channels and v % 128 == 0:
        rows = v // 128
        # Per 128-voxel row of the double-buffered in+out tiles (dense planes:
        # no sublane padding waste as long as tile_rows is 8-aligned).
        per_row = 2 * (c_in * in_item + c_out * out_item) * 128
        tile_rows = _choose_tile(
            rows, 8, per_row, _PIPELINE_VMEM_BUDGET, n,
            requested=None if voxel_tile is None else max(1, voxel_tile // 128))
        grid = (n, pl.cdiv(rows, tile_rows))

        x4 = x.reshape(n, c_in, rows, 128)                 # metadata-only view
        w2d = weight.reshape(c_out, c_in).astype(jnp.float32)
        b1d = bias.astype(jnp.float32)

        out4 = pl.pallas_call(
            _make_vpu_kernel_planes(c_in, c_out),
            out_shape=jax.ShapeDtypeStruct((n, c_out, rows, 128), out_dtype),
            grid=grid,
            in_specs=[
                pl.BlockSpec(memory_space=pltpu.MemorySpace.SMEM),
                pl.BlockSpec(memory_space=pltpu.MemorySpace.SMEM),
                pl.BlockSpec((None, c_in, tile_rows, 128),
                             lambda i, j: (i, 0, j, 0)),
            ],
            out_specs=pl.BlockSpec((None, c_out, tile_rows, 128),
                                   lambda i, j: (i, 0, j, 0)),
            compiler_params=compiler_params,
            cost_estimate=cost,
        )(w2d, b1d, x4)
        return out4.reshape(n, c_out, d, h, w)

    # ---------------- (C, tile_v) row layout: MXU / VPU fallback ------------
    # Sublane-padding-aware VMEM accounting: a (c, tile_v) block physically
    # occupies ceil(c / sublane) * sublane rows.
    c_in_pad = -(-c_in // _sublane(x.dtype)) * _sublane(x.dtype)
    c_out_pad = -(-c_out // _sublane(out_dtype)) * _sublane(out_dtype)
    per_voxel = 2 * (c_in_pad * in_item + c_out_pad * out_item)
    tile_v = _choose_tile(v, 128, per_voxel, _PIPELINE_VMEM_BUDGET, n,
                          requested=voxel_tile)
    grid = (n, pl.cdiv(v, tile_v))

    x3 = x.reshape(n, c_in, v)                             # metadata-only view
    x_spec = pl.BlockSpec((None, c_in, tile_v), lambda i, j: (i, 0, j))
    o_spec = pl.BlockSpec((None, c_out, tile_v), lambda i, j: (i, 0, j))

    if small_channels:
        # V not a multiple of 128: keep the row layout but write each output
        # row directly and upcast per-channel (no concatenate / full-tile cast).
        w2d = weight.reshape(c_out, c_in).astype(jnp.float32)
        b1d = bias.astype(jnp.float32)
        out3 = pl.pallas_call(
            _make_vpu_kernel_rows(c_in, c_out),
            out_shape=jax.ShapeDtypeStruct((n, c_out, v), out_dtype),
            grid=grid,
            in_specs=[
                pl.BlockSpec(memory_space=pltpu.MemorySpace.SMEM),
                pl.BlockSpec(memory_space=pltpu.MemorySpace.SMEM),
                x_spec,
            ],
            out_specs=o_spec,
            compiler_params=compiler_params,
            cost_estimate=cost,
        )(w2d, b1d, x3)
    else:
        # MXU path.  Weight is kept in the activation dtype (matches a PyTorch
        # module whose parameters share the activation dtype); for f32 inputs
        # precision=HIGHEST in the kernel preserves full f32 accuracy.
        w2d = weight.reshape(c_out, c_in).astype(x.dtype)
        b2d = bias.reshape(c_out, 1).astype(jnp.float32)
        out3 = pl.pallas_call(
            _mxu_kernel,
            out_shape=jax.ShapeDtypeStruct((n, c_out, v), out_dtype),
            grid=grid,
            in_specs=[
                x_spec,
                pl.BlockSpec((c_out, c_in), lambda i, j: (0, 0)),
                pl.BlockSpec((c_out, 1), lambda i, j: (0, 0)),
            ],
            out_specs=o_spec,
            compiler_params=compiler_params,
            cost_estimate=cost,
        )(x3, w2d, b2d)

    return out3.reshape(n, c_out, d, h, w)


def _reference(x, weight, bias):
    # Pure-JAX reference of a 1x1x1 Conv3d (highest precision for comparison).
    w2d = weight.reshape(weight.shape[0], weight.shape[1])
    y = jnp.einsum("ncdhw,oc->nodhw", x, w2d,
                   precision=jax.lax.Precision.HIGHEST)
    return (y + bias[None, :, None, None, None]).astype(x.dtype)


if __name__ == "__main__":
    key = jax.random.PRNGKey(0)
    keys = jax.random.split(key, 9)

    # --- Typical FeatureMapBlock3D shapes (tiny channels, V % 128 == 0):
    #     dense (rows, 128) VPU path. ---
    N, C_IN, C_OUT = 2, 4, 3
    D = H = W = 8
    x = jax.random.normal(keys[0], (N, C_IN, D, H, W), dtype=jnp.float32)
    weight = jax.random.normal(keys[1], (C_OUT, C_IN, 1, 1, 1),
                               dtype=jnp.float32) * 0.1
    bias = jax.random.normal(keys[2], (C_OUT,), dtype=jnp.float32) * 0.1

    out = jax.block_until_ready(feature_map_block_3d(x, weight, bias))
    ref = _reference(x, weight, bias)
    assert out.shape == (N, C_OUT, D, H, W), out.shape
    assert jnp.allclose(out, ref, atol=1e-4, rtol=1e-4), float(
        jnp.max(jnp.abs(out - ref)))

    # --- Tiny channels, V % 128 != 0: row-layout VPU fallback. ---
    xb = jax.random.normal(keys[3], (1, 3, 4, 6, 5), dtype=jnp.float32)
    wb = jax.random.normal(keys[4], (2, 3, 1, 1, 1), dtype=jnp.float32) * 0.1
    bb = jax.random.normal(keys[5], (2,), dtype=jnp.float32) * 0.1
    outb = jax.block_until_ready(feature_map_block_3d(xb, wb, bb))
    refb = _reference(xb, wb, bb)
    assert outb.shape == (1, 2, 4, 6, 5), outb.shape
    assert jnp.allclose(outb, refb, atol=1e-4, rtol=1e-4), float(
        jnp.max(jnp.abs(outb - refb)))

    # --- Larger channel counts: MXU path (precision=HIGHEST -> tight tol). ---
    N2, C_IN2, C_OUT2 = 1, 16, 8
    x2 = jax.random.normal(keys[6], (N2, C_IN2, D, H, W), dtype=jnp.float32)
    w2 = jax.random.normal(keys[7], (C_OUT2, C_IN2, 1, 1, 1),
                           dtype=jnp.float32) * 0.1
    b2 = jax.random.normal(keys[8], (C_OUT2,), dtype=jnp.float32) * 0.1
    out2 = jax.block_until_ready(feature_map_block_3d(x2, w2, b2))
    ref2 = _reference(x2, w2, b2)
    assert out2.shape == (N2, C_OUT2, D, H, W), out2.shape
    assert jnp.allclose(out2, ref2, atol=1e-4, rtol=1e-4), float(
        jnp.max(jnp.abs(out2 - ref2)))

    print("KERNEL_OK")
</pallas_src>

<mosaic_0001>
module attributes {stable_mosaic.version = 11 : i64} {
  func.func @kernel(%arg0: i32, %arg1: i32, %arg2: memref<3x4xf32, #tpu.memory_space<smem>>, %arg3: memref<3xf32, #tpu.memory_space<smem>>, %arg4: memref<1x4x4x128xf32, #tpu.memory_space<vmem>>, %arg5: memref<1x3x4x128xf32, #tpu.memory_space<vmem>>) attributes {dimension_semantics = [#tpu.dimension_semantics<parallel>, #tpu.dimension_semantics<parallel>], iteration_bounds = array<i64: 2, 1>, scalar_prefetch = 0 : i64, scratch_operands = 0 : i64, tpu.core_type = #tpu.core_type<tc>, window_params = [{transform_indices = @transform_0, window_bounds = array<i64: 3, 4>}, {transform_indices = @transform_1, window_bounds = array<i64: 3>}, {transform_indices = @transform_2, window_bounds = array<i64: 1, 4, 4, 128>}, {transform_indices = @transform_3, window_bounds = array<i64: 1, 3, 4, 128>}]} {
    %c0 = arith.constant 0 : index
    %c0_0 = arith.constant 0 : index
    %0 = memref.load %arg2[%c0, %c0_0] : memref<3x4xf32, #tpu.memory_space<smem>>
    %c0_1 = arith.constant 0 : index
    %c0_2 = arith.constant 0 : index
    %c0_3 = arith.constant 0 : index
    %c0_4 = arith.constant 0 : index
    %1 = vector.load %arg4[%c0_1, %c0_2, %c0_3, %c0_4] : memref<1x4x4x128xf32, #tpu.memory_space<vmem>>, vector<1x1x4x128xf32>
    %2 = vector.shape_cast %1 : vector<1x1x4x128xf32> to vector<4x128xf32>
    %3 = vector.broadcast %0 : f32 to vector<4x128xf32>
    %4 = arith.mulf %3, %2 : vector<4x128xf32>
    %c0_5 = arith.constant 0 : index
    %c1 = arith.constant 1 : index
    %5 = memref.load %arg2[%c0_5, %c1] : memref<3x4xf32, #tpu.memory_space<smem>>
    %c0_6 = arith.constant 0 : index
    %c1_7 = arith.constant 1 : index
    %c0_8 = arith.constant 0 : index
    %c0_9 = arith.constant 0 : index
    %6 = vector.load %arg4[%c0_6, %c1_7, %c0_8, %c0_9] : memref<1x4x4x128xf32, #tpu.memory_space<vmem>>, vector<1x1x4x128xf32>
    %7 = vector.shape_cast %6 : vector<1x1x4x128xf32> to vector<4x128xf32>
    %8 = vector.broadcast %5 : f32 to vector<4x128xf32>
    %9 = arith.mulf %8, %7 : vector<4x128xf32>
    %10 = arith.addf %4, %9 : vector<4x128xf32>
    %c0_10 = arith.constant 0 : index
    %c2 = arith.constant 2 : index
    %11 = memref.load %arg2[%c0_10, %c2] : memref<3x4xf32, #tpu.memory_space<smem>>
    %c0_11 = arith.constant 0 : index
    %c2_12 = arith.constant 2 : index
    %c0_13 = arith.constant 0 : index
    %c0_14 = arith.constant 0 : index
    %12 = vector.load %arg4[%c0_11, %c2_12, %c0_13, %c0_14] : memref<1x4x4x128xf32, #tpu.memory_space<vmem>>, vector<1x1x4x128xf32>
    %13 = vector.shape_cast %12 : vector<1x1x4x128xf32> to vector<4x128xf32>
    %14 = vector.broadcast %11 : f32 to vector<4x128xf32>
    %15 = arith.mulf %14, %13 : vector<4x128xf32>
    %16 = arith.addf %10, %15 : vector<4x128xf32>
    %c0_15 = arith.constant 0 : index
    %c3 = arith.constant 3 : index
    %17 = memref.load %arg2[%c0_15, %c3] : memref<3x4xf32, #tpu.memory_space<smem>>
    %c0_16 = arith.constant 0 : index
    %c3_17 = arith.constant 3 : index
    %c0_18 = arith.constant 0 : index
    %c0_19 = arith.constant 0 : index
    %18 = vector.load %arg4[%c0_16, %c3_17, %c0_18, %c0_19] : memref<1x4x4x128xf32, #tpu.memory_space<vmem>>, vector<1x1x4x128xf32>
    %19 = vector.shape_cast %18 : vector<1x1x4x128xf32> to vector<4x128xf32>
    %20 = vector.broadcast %17 : f32 to vector<4x128xf32>
    %21 = arith.mulf %20, %19 : vector<4x128xf32>
    %22 = arith.addf %16, %21 : vector<4x128xf32>
    %c0_20 = arith.constant 0 : index
    %23 = memref.load %arg3[%c0_20] : memref<3xf32, #tpu.memory_space<smem>>
    %24 = vector.broadcast %23 : f32 to vector<4x128xf32>
    %25 = arith.addf %22, %24 : vector<4x128xf32>
    %c0_21 = arith.constant 0 : index
    %c0_22 = arith.constant 0 : index
    %c0_23 = arith.constant 0 : index
    %c0_24 = arith.constant 0 : index
    %26 = vector.load %arg5[%c0_21, %c0_22, %c0_23, %c0_24] : memref<1x3x4x128xf32, #tpu.memory_space<vmem>>, vector<1x1x4x128xf32>
    %27 = vector.shape_cast %26 : vector<1x1x4x128xf32> to vector<4x128xf32>
    %28 = vector.shape_cast %25 : vector<4x128xf32> to vector<1x1x4x128xf32>
    tpu.vector_store %arg5[%c0_21, %c0_22, %c0_23, %c0_24], %28 {strides = array<i32>} : memref<1x3x4x128xf32, #tpu.memory_space<vmem>>, vector<1x1x4x128xf32>,
    %c1_25 = arith.constant 1 : index
    %c0_26 = arith.constant 0 : index
    %29 = memref.load %arg2[%c1_25, %c0_26] : memref<3x4xf32, #tpu.memory_space<smem>>
    %c0_27 = arith.constant 0 : index
    %c0_28 = arith.constant 0 : index
    %c0_29 = arith.constant 0 : index
    %c0_30 = arith.constant 0 : index
    %30 = vector.load %arg4[%c0_27, %c0_28, %c0_29, %c0_30] : memref<1x4x4x128xf32, #tpu.memory_space<vmem>>, vector<1x1x4x128xf32>
    %31 = vector.shape_cast %30 : vector<1x1x4x128xf32> to vector<4x128xf32>
    %32 = vector.broadcast %29 : f32 to vector<4x128xf32>
    %33 = arith.mulf %32, %31 : vector<4x128xf32>
    %c1_31 = arith.constant 1 : index
    %c1_32 = arith.constant 1 : index
    %34 = memref.load %arg2[%c1_31, %c1_32] : memref<3x4xf32, #tpu.memory_space<smem>>
    %c0_33 = arith.constant 0 : index
    %c1_34 = arith.constant 1 : index
    %c0_35 = arith.constant 0 : index
    %c0_36 = arith.constant 0 : index
    %35 = vector.load %arg4[%c0_33, %c1_34, %c0_35, %c0_36] : memref<1x4x4x128xf32, #tpu.memory_space<vmem>>, vector<1x1x4x128xf32>
    %36 = vector.shape_cast %35 : vector<1x1x4x128xf32> to vector<4x128xf32>
    %37 = vector.broadcast %34 : f32 to vector<4x128xf32>
    %38 = arith.mulf %37, %36 : vector<4x128xf32>
    %39 = arith.addf %33, %38 : vector<4x128xf32>
    %c1_37 = arith.constant 1 : index
    %c2_38 = arith.constant 2 : index
    %40 = memref.load %arg2[%c1_37, %c2_38] : memref<3x4xf32, #tpu.memory_space<smem>>
    %c0_39 = arith.constant 0 : index
    %c2_40 = arith.constant 2 : index
    %c0_41 = arith.constant 0 : index
    %c0_42 = arith.constant 0 : index
    %41 = vector.load %arg4[%c0_39, %c2_40, %c0_41, %c0_42] : memref<1x4x4x128xf32, #tpu.memory_space<vmem>>, vector<1x1x4x128xf32>
    %42 = vector.shape_cast %41 : vector<1x1x4x128xf32> to vector<4x128xf32>
    %43 = vector.broadcast %40 : f32 to vector<4x128xf32>
    %44 = arith.mulf %43, %42 : vector<4x128xf32>
    %45 = arith.addf %39, %44 : vector<4x128xf32>
    %c1_43 = arith.constant 1 : index
    %c3_44 = arith.constant 3 : index
    %46 = memref.load %arg2[%c1_43, %c3_44] : memref<3x4xf32, #tpu.memory_space<smem>>
    %c0_45 = arith.constant 0 : index
    %c3_46 = arith.constant 3 : index
    %c0_47 = arith.constant 0 : index
    %c0_48 = arith.constant 0 : index
    %47 = vector.load %arg4[%c0_45, %c3_46, %c0_47, %c0_48] : memref<1x4x4x128xf32, #tpu.memory_space<vmem>>, vector<1x1x4x128xf32>
    %48 = vector.shape_cast %47 : vector<1x1x4x128xf32> to vector<4x128xf32>
    %49 = vector.broadcast %46 : f32 to vector<4x128xf32>
    %50 = arith.mulf %49, %48 : vector<4x128xf32>
    %51 = arith.addf %45, %50 : vector<4x128xf32>
    %c1_49 = arith.constant 1 : index
    %52 = memref.load %arg3[%c1_49] : memref<3xf32, #tpu.memory_space<smem>>
    %53 = vector.broadcast %52 : f32 to vector<4x128xf32>
    %54 = arith.addf %51, %53 : vector<4x128xf32>
    %c0_50 = arith.constant 0 : index
    %c1_51 = arith.constant 1 : index
    %c0_52 = arith.constant 0 : index
    %c0_53 = arith.constant 0 : index
    %55 = vector.load %arg5[%c0_50, %c1_51, %c0_52, %c0_53] : memref<1x3x4x128xf32, #tpu.memory_space<vmem>>, vector<1x1x4x128xf32>
    %56 = vector.shape_cast %55 : vector<1x1x4x128xf32> to vector<4x128xf32>
    %57 = vector.shape_cast %54 : vector<4x128xf32> to vector<1x1x4x128xf32>
    tpu.vector_store %arg5[%c0_50, %c1_51, %c0_52, %c0_53], %57 {strides = array<i32>} : memref<1x3x4x128xf32, #tpu.memory_space<vmem>>, vector<1x1x4x128xf32>,
    %c2_54 = arith.constant 2 : index
    %c0_55 = arith.constant 0 : index
    %58 = memref.load %arg2[%c2_54, %c0_55] : memref<3x4xf32, #tpu.memory_space<smem>>
    %c0_56 = arith.constant 0 : index
    %c0_57 = arith.constant 0 : index
    %c0_58 = arith.constant 0 : index
    %c0_59 = arith.constant 0 : index
    %59 = vector.load %arg4[%c0_56, %c0_57, %c0_58, %c0_59] : memref<1x4x4x128xf32, #tpu.memory_space<vmem>>, vector<1x1x4x128xf32>
    %60 = vector.shape_cast %59 : vector<1x1x4x128xf32> to vector<4x128xf32>
    %61 = vector.broadcast %58 : f32 to vector<4x128xf32>
    %62 = arith.mulf %61, %60 : vector<4x128xf32>
    %c2_60 = arith.constant 2 : index
    %c1_61 = arith.constant 1 : index
    %63 = memref.load %arg2[%c2_60, %c1_61] : memref<3x4xf32, #tpu.memory_space<smem>>
    %c0_62 = arith.constant 0 : index
    %c1_63 = arith.constant 1 : index
    %c0_64 = arith.constant 0 : index
    %c0_65 = arith.constant 0 : index
    %64 = vector.load %arg4[%c0_62, %c1_63, %c0_64, %c0_65] : memref<1x4x4x128xf32, #tpu.memory_space<vmem>>, vector<1x1x4x128xf32>
    %65 = vector.shape_cast %64 : vector<1x1x4x128xf32> to vector<4x128xf32>
    %66 = vector.broadcast %63 : f32 to vector<4x128xf32>
    %67 = arith.mulf %66, %65 : vector<4x128xf32>
    %68 = arith.addf %62, %67 : vector<4x128xf32>
    %c2_66 = arith.constant 2 : index
    %c2_67 = arith.constant 2 : index
    %69 = memref.load %arg2[%c2_66, %c2_67] : memref<3x4xf32, #tpu.memory_space<smem>>
    %c0_68 = arith.constant 0 : index
    %c2_69 = arith.constant 2 : index
    %c0_70 = arith.constant 0 : index
    %c0_71 = arith.constant 0 : index
    %70 = vector.load %arg4[%c0_68, %c2_69, %c0_70, %c0_71] : memref<1x4x4x128xf32, #tpu.memory_space<vmem>>, vector<1x1x4x128xf32>
    %71 = vector.shape_cast %70 : vector<1x1x4x128xf32> to vector<4x128xf32>
    %72 = vector.broadcast %69 : f32 to vector<4x128xf32>
    %73 = arith.mulf %72, %71 : vector<4x128xf32>
    %74 = arith.addf %68, %73 : vector<4x128xf32>
    %c2_72 = arith.constant 2 : index
    %c3_73 = arith.constant 3 : index
    %75 = memref.load %arg2[%c2_72, %c3_73] : memref<3x4xf32, #tpu.memory_space<smem>>
    %c0_74 = arith.constant 0 : index
    %c3_75 = arith.constant 3 : index
    %c0_76 = arith.constant 0 : index
    %c0_77 = arith.constant 0 : index
    %76 = vector.load %arg4[%c0_74, %c3_75, %c0_76, %c0_77] : memref<1x4x4x128xf32, #tpu.memory_space<vmem>>, vector<1x1x4x128xf32>
    %77 = vector.shape_cast %76 : vector<1x1x4x128xf32> to vector<4x128xf32>
    %78 = vector.broadcast %75 : f32 to vector<4x128xf32>
    %79 = arith.mulf %78, %77 : vector<4x128xf32>
    %80 = arith.addf %74, %79 : vector<4x128xf32>
    %c2_78 = arith.constant 2 : index
    %81 = memref.load %arg3[%c2_78] : memref<3xf32, #tpu.memory_space<smem>>
    %82 = vector.broadcast %81 : f32 to vector<4x128xf32>
    %83 = arith.addf %80, %82 : vector<4x128xf32>
    %c0_79 = arith.constant 0 : index
    %c2_80 = arith.constant 2 : index
    %c0_81 = arith.constant 0 : index
    %c0_82 = arith.constant 0 : index
    %84 = vector.load %arg5[%c0_79, %c2_80, %c0_81, %c0_82] : memref<1x3x4x128xf32, #tpu.memory_space<vmem>>, vector<1x1x4x128xf32>
    %85 = vector.shape_cast %84 : vector<1x1x4x128xf32> to vector<4x128xf32>
    %86 = vector.shape_cast %83 : vector<4x128xf32> to vector<1x1x4x128xf32>
    tpu.vector_store %arg5[%c0_79, %c2_80, %c0_81, %c0_82], %86 {strides = array<i32>} : memref<1x3x4x128xf32, #tpu.memory_space<vmem>>, vector<1x1x4x128xf32>,
    return
  }
  func.func @transform_0(%arg0: i32, %arg1: i32) -> (i32, i32) {
    %c0_i32 = arith.constant 0 : i32
    %c0_i32_0 = arith.constant 0 : i32
    %c0_i32_1 = arith.constant 0 : i32
    return %c0_i32, %c0_i32_0 : i32, i32
  }
  func.func @transform_1(%arg0: i32, %arg1: i32) -> i32 {
    %c0_i32 = arith.constant 0 : i32
    %c0_i32_0 = arith.constant 0 : i32
    return %c0_i32 : i32
  }
  func.func @transform_2(%arg0: i32, %arg1: i32) -> (i32, i32, i32, i32) {
    %c0_i32 = arith.constant 0 : i32
    %c0_i32_0 = arith.constant 0 : i32
    %c0_i32_1 = arith.constant 0 : i32
    return %arg0, %c0_i32, %arg1, %c0_i32_0 : i32, i32, i32, i32
  }
  func.func @transform_3(%arg0: i32, %arg1: i32) -> (i32, i32, i32, i32) {
    %c0_i32 = arith.constant 0 : i32
    %c0_i32_0 = arith.constant 0 : i32
    %c0_i32_1 = arith.constant 0 : i32
    return %arg0, %c0_i32, %arg1, %c0_i32_0 : i32, i32, i32, i32
  }
}

</mosaic_0001>

<bundles_post_ra>
// kernel: feature_map_block_3d.1
= control target key start
LH: loop header
LB: loop body
LE: loop exit
PB: predicated region body
PF: predicated region fallthrough
CT: control target
= control target key end

     0   :  { %8 = vsyncpa [#allocation3], 0  ;;  %s680_s0 = inlined_call_operand.vmem [shape: f32[3,4], index: 0, kind: input, shape index: {}]   ;;  %s681_s1 = inlined_call_operand.vmem [shape: f32[3], index: 1, kind: input, shape index: {}]   ;;  %s682_s2 = inlined_call_operand.vmem [shape: f32[2,4,4,128], index: 2, kind: input, shape index: {}]   ;;  %s683_s3 = inlined_call_operand.vmem [shape: f32[2,3,4,128], index: 3, kind: output, shape index: {}]  }
   0x1   :  { %9 = vsyncpa [#allocation5], 0  ;;  %s578_s12 = smov 0   ;;  %s580_s13 = smov 0  }
   0x2   :  { %s582_s14 = smov 0  }
   0x3 LB: > { %s409_s15 = sadd.s32 4294967295, %s554_s14   ;;  %s27_s16 = sadd.s32 1, %s550_s13  ;;  %s554_s14 = sphi %s582_s14, %s15_s14   ;;  %s550_s13 = sphi %s580_s13, %s693_s13   ;;  %s546_s12 = sphi %s578_s12, %s692_s12  }
   0x4   : > { %p29_p0 = scmp.ge.s32.totalorder %s27_s16, 2  ;;  %p411_p1 = scmp.ge.s32.totalorder %s554_s14, 1 }
   0x5   : > { %p130_p2 = scmp.lt.s32.totalorder %s554_s14, 3  ;;  %p603_p4 = scmp.eq.s32.totalorder %s409_s15, 0 }
   0x6   : > { %s695_s16 = smov (%p29_p0, %s27_s16), 0  ;;  %s143_s21 = sshll.u32 %s680_s0, 4  ;;  %s144_s21 = int_to_ptr.vmem [resolvable:$true] %s143_s21 }
   0x7   : > { %p599_p3 = pnand %p411_p1, %p130_p2  ;;  %s154_s24 = sshll.u32 %s681_s1, 4  ;;  %s155_s24 = int_to_ptr.vmem [resolvable:$true] %s154_s24 }
   0x8   : > { %s688_s18 = scalar_select %p603_p4, 1, 0 }
   0x9   : > { %s687_s17 = scalar_select %p599_p3, 1, 0 }
   0xa   : > { %p457_p5 = pneg %p599_p3  ;;  %s494_s26 = scalar_lea.vmem %s144_s21, 64 }
   0xb   : > { %p495_p7 = scmp.ne.s32.totalorder %s144_s21, %s494_s26  ;;  %p502_p11 = scmp.lt.s32.totalorder %s144_s21, %s144_s21 }
   0xc   : > { %p617_p6 = pnand %p603_p4, %p457_p5  ;;  %p503_p12 = scmp.lt.s32.totalorder %s494_s26, %s494_s26 }
   0xe   : > { %p496_p8 = pneg %p617_p6  ;;  %p504_p13 = por %p503_p12, %p502_p11 }
  0x10   : > { %p497_p9 = pnand %p496_p8, %p495_p7 }
  0x12   : > { %p498_p10 = pneg %p497_p9 }
  0x14   : > { %p505_p0 = pnand %p504_p13, %p498_p10 }
  0x16   : > { %508 = shalt.err (!%p505_p0)
}
  0x17   : > { %s556_s27 = smov [#allocation2]   ;;  %s509_s28 = scalar_lea.vmem %s155_s24, 16 }
  0x18   : > { %460 = dma.vmem_to_smem (!%p617_p6), %s144_s21, 64, %s556_s27, [#allocation3]  }
  0x19   : > { %p510_p1 = scmp.ne.s32.totalorder %s155_s24, %s509_s28  ;;  %p517_p4 = scmp.lt.s32.totalorder %s155_s24, %s155_s24 }
  0x1a   : > { %p518_p3 = scmp.lt.s32.totalorder %s509_s28, %s509_s28 }
  0x1b   : > { %p512_p2 = pnand %p510_p1, %p496_p8 }
  0x1c   : > { %p519_p7 = por %p518_p3, %p517_p4 }
  0x1d   : > { %p513_p5 = pneg %p512_p2 }
  0x1f   : > { %p520_p9 = pnand %p519_p7, %p513_p5 }
  0x21   : > { %523 = shalt.err (!%p520_p9)
}
  0x22   : > { %s557_s29 = smov [#allocation4]   ;;  %p690_p10 = scmp.ne.s32.totalorder %s687_s17, 0 }
  0x23   : > { %463 = dma.vmem_to_smem (!%p617_p6), %s155_s24, 16, %s557_s29, [#allocation5]  }
  0x24   : > { %178 = sbr.rel (%p690_p10) target bundleno = 76 (0x4c), region = 32  ;;  %p691_p11 = scmp.ne.s32.totalorder (!%p690_p10), %s688_s18, 0 }
  0x29   : > { %537 = dma.done.wait (%p691_p11), [#allocation3], 64  }
  0x2a   : > { %539 = vsyncadd (%p691_p11), [#allocation3], 4294967232 }
  0x2b   : > { %541 = dma.done.wait (%p691_p11), [#allocation5], 16  }
  0x2c   : > { %543 = vsyncadd (%p691_p11), [#allocation5], 4294967280 }
  0x2d   : > { %188 = sfence }
  0x2e   : > { %p213_p3 = scmp.lt.s32.totalorder %s546_s12, 1  ;;  %s229_s30 = sld [smem:[#allocation2]] }
  0x2f   : > { %s421_s4 = sld [smem:[#allocation2 + $0x1]] }
  0x30   : > { %s697_s12 = smov (!%p213_p3, %s546_s12), 1  ;;  %s423_s5 = sld [smem:[#allocation2 + $0x2]] }
  0x31   : > { %s447_s6 = sshll.u32 %s697_s12, 4  ;;  %s425_s10 = sld [smem:[#allocation2 + $0x3]] }
  0x32   : > { %s645_s9 = scalar_lea.vmem %s682_s2, %s447_s6  ;;  %s251_s11 = sld [smem:[#allocation4]] }
  0x33   : > { %v230_v0 = vld [vmem:[%s645_s9] sm:$0xf]  ;;  %v422_v2 = vld [vmem:[%s645_s9 + $0x4] sm:$0xf]  ;;  %v424_v5 = vld [vmem:[%s645_s9 + $0x8] sm:$0xf] }
  0x34   : > { %v231_v1 = vstv %s229_s30  ;;  %s427_s15 = sld [smem:[#allocation2 + $0x80]]  ;;  %v426_v8 = vld [vmem:[%s645_s9 + $0xc] sm:$0xf]  ;;  %s448_s19 = smul.u32 12, %s697_s12  ;;  %v256_v14 = vld [vmem:[%s645_s9] sm:$0xf] }
  0x35   : > { %v232_v3 = vmul.f32 %v231_v1, %v230_v0  ;;  %v236_v4 = vstv %s421_s4  ;;  %s428_s17 = sld [smem:[#allocation2 + $0x81]]  ;;  %v429_v16 = vld [vmem:[%s645_s9 + $0x4] sm:$0xf]  ;;  %v431_v19 = vld [vmem:[%s645_s9 + $0x8] sm:$0xf] }
  0x36   : > { %v237_v6 = vmul.f32 %v422_v2, %v236_v4  ;;  %v242_v7 = vstv %s423_s5  ;;  %s430_s18 = sld [smem:[#allocation2 + $0x82]]  ;;  %s660_s12 = scalar_lea.vmem %s683_s3, %s448_s19  ;;  %v433_v22 = vld [vmem:[%s645_s9 + $0xc] sm:$0xf]  ;;  %v280_v28 = vld [vmem:[%s645_s9] sm:$0xf] }
  0x37   : > { %v243_v10 = vmul.f32 %v424_v5, %v242_v7  ;;  %v248_v11 = vstv %s425_s10  ;;  %s432_s20 = sld [smem:[#allocation2 + $0x83]]  ;;  %v438_v31 = vld [vmem:[%s645_s9 + $0x4] sm:$0xf]  ;;  %v440_v33 = vld [vmem:[%s645_s9 + $0x8] sm:$0xf] }
  0x38   : > { %v238_v9 = vadd.f32 %v237_v6, %v232_v3  ;;  %v249_v13 = vmul.f32 %v426_v8, %v248_v11  ;;  %s653_s21 = sld [smem:[#allocation4 + $0x1]]  ;;  %v252_v15 = vstv %s251_s11  ;;  %v442_v37 = vld [vmem:[%s645_s9 + $0xc] sm:$0xf] }
  0x39   : > { %s436_s22 = sld [smem:[#allocation2 + $0x100]] }
  0x3a   : > { %v244_v12 = vadd.f32 %v243_v10, %v238_v9  ;;  %v257_v18 = vstv %s427_s15  ;;  %s437_s23 = sld [smem:[#allocation2 + $0x101]] }
  0x3b   : > { %v258_v20 = vmul.f32 %v257_v18, %v256_v14  ;;  %v261_v21 = vstv %s428_s17  ;;  %s439_s26 = sld [smem:[#allocation2 + $0x102]] }
  0x3c   : > { %v250_v17 = vadd.f32 %v249_v13, %v244_v12  ;;  %v262_v24 = vmul.f32 %v429_v16, %v261_v21  ;;  %v266_v25 = vstv %s430_s18  ;;  %s441_s27 = sld [smem:[#allocation2 + $0x103]] }
  0x3d   : > { %v267_v26 = vmul.f32 %v431_v19, %v266_v25  ;;  %v271_v27 = vstv %s432_s20  ;;  %s443_s28 = sld [smem:[#allocation4 + $0x2]] }
  0x3e   : > { %v253_v23 = vadd.f32 %v252_v15, %v250_v17  ;;  %v263_v29 = vadd.f32 %v262_v24, %v258_v20  ;;  %v272_v30 = vmul.f32 %v433_v22, %v271_v27  ;;  %v275_v38 = vstv %s653_s21 }
  0x3f   : > { %v281_v32 = vstv %s436_s22 }
  0x40   : > { %254 = vst [vmem:[%s660_s12] sm:$0xf] %v253_v23  ;;  %v268_v34 = vadd.f32 %v267_v26, %v263_v29  ;;  %v282_v35 = vmul.f32 %v281_v32, %v280_v28  ;;  %v285_v36 = vstv %s437_s23 }
  0x41   : > { %v286_v39 = vmul.f32 %v438_v31, %v285_v36  ;;  %v290_v40 = vstv %s439_s26 }
  0x42   : > { %v273_v41 = vadd.f32 %v272_v30, %v268_v34  ;;  %v291_v42 = vmul.f32 %v440_v33, %v290_v40  ;;  %v295_v43 = vstv %s441_s27 }
  0x43   : > { %v287_v44 = vadd.f32 %v286_v39, %v282_v35  ;;  %v296_v45 = vmul.f32 %v442_v37, %v295_v43  ;;  %v299_v48 = vstv %s443_s28 }
  0x44   : > { %v276_v46 = vadd.f32 %v275_v38, %v273_v41 }
  0x45   : > { %v292_v47 = vadd.f32 %v291_v42, %v287_v44 }
  0x46   : > { %435 = vst [vmem:[%s660_s12 + $0x4] sm:$0xf] %v276_v46 }
  0x47   : > { %v297_v49 = vadd.f32 %v296_v45, %v292_v47 }
  0x49   : > { %v300_v50 = vadd.f32 %v299_v48, %v297_v49 }
  0x4b   : > { %444 = vst [vmem:[%s660_s12 + $0x8] sm:$0xf] %v300_v50 }
  0x4c PF: > { %s15_s14 = sadd.s32 1, %s554_s14   ;;  %s692_s12 = smov %s550_s13 }
  0x4d   : > { %p12_p4 = scmp.ge.s32.totalorder %s15_s14, 4   ;;  %s693_s13 = smov %s695_s16 }
  0x4f   :  { %14 = sbr.rel (!%p12_p4) target bundleno = 3 (0x3), region = 76 }
  0x54   :  { %330 = vsyncpa [#allocation3], 1 }
  0x55   :  { %332 = vsyncpa [#allocation3 + $0x1], 1 }
  0x56   :  { %333 = vsyncpa [#allocation5], 1 }

</bundles_post_ra>
